<compile_context>
chip_gen: v6e
topology: v6e:2x2x1
jax: 0.10.0
libtpu: 0.0.40
codegen_flags: <defaults>
</compile_context>

<pallas_src>
import functools

import jax
import jax.numpy as jnp
from jax import lax
from jax.experimental import pallas as pl
from jax.experimental.pallas import tpu as pltpu


# --------------------------------------------------------------------------
# In-kernel helpers
# --------------------------------------------------------------------------
def _leaky(v):
    return jnp.where(v >= 0.0, v, 0.1 * v)            # LeakyReLU(negative_slope=0.1)


def _mlp_scale_rows(avg_col, max_col, w1r, w2tr, b1, b2c, sel, sel_t):
    """fc(avg)+fc(max) evaluated per (batch, channel) ROW, reshape-free.

    avg_col / max_col : (RB, 1) f32 pooled stats, row p = batch*C + channel.
    w1r  (RB, R) : w1 tiled per batch   w1r[p, r]  = w1[p % C, r]
    w2tr (RB, R) : w2^T tiled per batch w2tr[p, r] = w2[r, p % C]
    b2c  (RB, 1) : b2 tiled per batch
    sel (NB, RB) / sel_t (RB, NB) : 0/1 selection matrices realising the
    per-batch segment sum and its broadcast back to rows.
    Returns the per-row scale 2*sigmoid(.) as (RB, 1) f32.
    """
    ga = avg_col * w1r                                                  # (RB, R) VPU
    gm = max_col * w1r
    ha = _leaky(jnp.dot(sel, ga, preferred_element_type=jnp.float32) + b1)   # (NB, R)
    hm = _leaky(jnp.dot(sel, gm, preferred_element_type=jnp.float32) + b1)
    hsum = ha + hm                                                      # fused MLP tail
    y_rows = jnp.dot(sel_t, hsum, preferred_element_type=jnp.float32)   # (RB, R)
    y_col = jnp.sum(y_rows * w2tr, axis=-1, keepdims=True) + 2.0 * b2c  # (RB, 1)
    return jax.nn.sigmoid(y_col) * 2.0


# --------------------------------------------------------------------------
# Kernels
# --------------------------------------------------------------------------
def _ca_fused_kernel(x_ref, w1r_ref, w2tr_ref, b1_ref, b2c_ref, sel_ref,
                     sel_t_ref, o_ref, *, hw_valid, inv_hw, needs_mask):
    """Fast path: whole spatial extent resident -> one read + one write of x."""
    x = x_ref[...]                                     # (RB, HWp), input dtype

    avg_col = jnp.sum(x, axis=-1, keepdims=True, dtype=jnp.float32) * inv_hw
    if needs_mask:   # HW padded to a lane multiple: keep pad out of the max
        col = lax.broadcasted_iota(jnp.int32, x.shape, 1)
        fill = jnp.asarray(jnp.finfo(x.dtype).min, dtype=x.dtype)
        xm = jnp.where(col < hw_valid, x, fill)
        max_col = jnp.max(xm, axis=-1, keepdims=True).astype(jnp.float32)
    else:
        max_col = jnp.max(x, axis=-1, keepdims=True).astype(jnp.float32)

    scale = _mlp_scale_rows(avg_col, max_col, w1r_ref[...], w2tr_ref[...],
                            b1_ref[...], b2c_ref[...], sel_ref[...],
                            sel_t_ref[...])
    o_ref[...] = (x * scale.astype(x.dtype)).astype(o_ref.dtype)


def _ca_reduce_kernel(x_ref, w1r_ref, w2tr_ref, b1_ref, b2c_ref, sel_ref,
                      sel_t_ref, scale_ref, sum_acc, max_acc, *,
                      hw_valid, inv_hw, spb, needs_mask):
    """Fallback pass 1: spatial-split sum/max accumulation + MLP at finalize."""
    j = pl.program_id(1)

    @pl.when(j == 0)
    def _():
        sum_acc[...] = jnp.zeros_like(sum_acc)
        max_acc[...] = jnp.full_like(max_acc, -jnp.inf)

    x = x_ref[...]                                     # (RB, SPB)
    if needs_mask:
        col = lax.broadcasted_iota(jnp.int32, x.shape, 1) + j * spb
        fill = jnp.asarray(jnp.finfo(x.dtype).min, dtype=x.dtype)
        x_for_max = jnp.where(col < hw_valid, x, fill)
    else:
        x_for_max = x

    sum_acc[...] += jnp.sum(x, axis=-1, keepdims=True, dtype=jnp.float32)
    max_acc[...] = jnp.maximum(
        max_acc[...],
        jnp.max(x_for_max, axis=-1, keepdims=True).astype(jnp.float32))

    @pl.when(j == pl.num_programs(1) - 1)
    def _():
        avg_col = sum_acc[...] * inv_hw
        scale_ref[...] = _mlp_scale_rows(
            avg_col, max_acc[...], w1r_ref[...], w2tr_ref[...], b1_ref[...],
            b2c_ref[...], sel_ref[...], sel_t_ref[...])


def _ca_rescale_kernel(x_ref, scale_ref, o_ref):
    """Fallback pass 2: lane-dense per-row rescale."""
    x = x_ref[...]
    o_ref[...] = (x * scale_ref[...].astype(x.dtype)).astype(o_ref.dtype)


# --------------------------------------------------------------------------
# Wrapper-side planning helpers
# --------------------------------------------------------------------------
def _vmem_capacity_bytes():
    """Physical per-core VMEM if the runtime exposes it (v5e/v6e: 128 MiB,
    v7x: 64 MiB).  Falls back to the conservative 64 MiB."""
    try:
        info = pltpu.get_tpu_info()
        for name in ("vmem_capacity_bytes", "vmem_size_bytes", "vmem_bytes"):
            v = getattr(info, name, None)
            if v:
                return int(v)
    except Exception:
        pass
    return 64 << 20


def _valid_row_splits(B, C):
    """Row-block counts nb such that each block is whole batches and either
    8-row aligned (full sublanes) or the entire row extent."""
    rows = B * C
    out = []
    for nb in range(1, B + 1):
        if B % nb:
            continue
        rb = (B // nb) * C
        if rb == rows or rb % 8 == 0:
            out.append(nb)
    return out


def _pick_fused_split(B, C, hw_pad, itemsize, target_bytes, block_budget):
    """Pick the number of row blocks for the fused (full-spatial) path.
    Prefers >= 2 blocks (v7x megacore), then the largest block <= target.
    Returns None if even the smallest whole-batch block exceeds the budget."""
    rows = B * C
    valid = _valid_row_splits(B, C)
    multi = [nb for nb in valid if nb >= 2]
    pool = multi if multi else valid
    for nb in sorted(pool):                       # largest blocks first
        if (rows // nb) * hw_pad * itemsize <= target_bytes:
            return nb
    for nb in sorted(pool):
        if (rows // nb) * hw_pad * itemsize <= block_budget:
            return nb
    return None


def _pick_spatial_split(rb, hw_pad, itemsize, target_bytes):
    """Largest 128-aligned divisor of hw_pad whose block fits target_bytes."""
    lanes = hw_pad // 128
    for d in range(lanes, 0, -1):
        if lanes % d:
            continue
        spb = d * 128
        if rb * spb * itemsize <= target_bytes:
            return spb
    return 128


def _vmem_limit(block_bytes, params_bytes, vmem_cap, bufs):
    need = bufs * block_bytes + 2 * params_bytes + (6 << 20)
    return int(min(vmem_cap, max(16 << 20, need)))


def _build_mlp_params(w1, b1, w2, b2, C, R, nbatch):
    """Batch-tiled, reshape-free parameter set for the in-kernel channel MLP."""
    w1f = jnp.asarray(w1, jnp.float32).reshape(C, R)
    w2f = jnp.asarray(w2, jnp.float32).reshape(R, C)
    b1f = jnp.asarray(b1, jnp.float32).reshape(1, R)
    b2f = jnp.asarray(b2, jnp.float32).reshape(C)
    rb = nbatch * C
    w1_rows = jnp.tile(w1f, (nbatch, 1))                      # (rb, R)
    w2t_rows = jnp.tile(w2f.T, (nbatch, 1))                   # (rb, R)
    b2_col = jnp.tile(b2f.reshape(C, 1), (nbatch, 1))         # (rb, 1)
    row = jnp.arange(rb, dtype=jnp.int32) // C
    sel = (row[None, :] == jnp.arange(nbatch, dtype=jnp.int32)[:, None]
           ).astype(jnp.float32)                              # (nbatch, rb)
    sel_t = jnp.transpose(sel)                                # (rb, nbatch)
    return w1_rows, w2t_rows, b1f, b2_col, sel, sel_t


# --------------------------------------------------------------------------
# Public wrapper
# --------------------------------------------------------------------------
def channel_attention(x, w1, b1, w2, b2, *,
                      target_block_bytes=None, max_block_bytes=None):
    """x: (B, C, H, W) -> x * 2*sigmoid(fc(avg_pool(x)) + fc(max_pool(x)))."""
    B, C, H, W = x.shape
    R = w1.shape[-1]
    rows = B * C
    HW = H * W
    HW_pad = pl.cdiv(HW, 128) * 128                 # lane-dense stores
    needs_mask = HW_pad != HW
    itemsize = x.dtype.itemsize

    x2 = x.reshape(rows, HW)
    if needs_mask:
        x2 = jnp.pad(x2, ((0, 0), (0, HW_pad - HW)))

    # ---- generation-aware VMEM budget / block targets -------------------
    cap = _vmem_capacity_bytes()
    if cap >= (96 << 20):                           # v5e / v6e: 128 MiB physical
        vmem_cap, target = 100 << 20, 12 << 20
    else:                                           # v7x (64 MiB) or unknown
        vmem_cap, target = 52 << 20, 6 << 20
    # 2*in + 2*out pipeline buffers plus kernel-internal block-sized temps
    # (f32 accumulation copies, masked-max mask/select) and Mosaic scratch.
    bufs = 8 if needs_mask else 6
    budget = (vmem_cap - (8 << 20)) // bufs
    if target_block_bytes is not None:
        target = target_block_bytes
    if max_block_bytes is not None:
        budget = max_block_bytes
    target = min(target, budget)

    nb = _pick_fused_split(B, C, HW_pad, itemsize, target, budget)

    if nb is not None:
        # ---- fast path: whole spatial extent resident per block ---------
        rb = rows // nb
        params = _build_mlp_params(w1, b1, w2, b2, C, R, rb // C)
        params_bytes = sum(int(p.size) * 4 for p in params)
        block_bytes = rb * HW_pad * itemsize
        vmem_limit = _vmem_limit(block_bytes, params_bytes, vmem_cap, bufs)

        kernel = functools.partial(_ca_fused_kernel, hw_valid=HW,
                                   inv_hw=1.0 / HW, needs_mask=needs_mask)
        out = pl.pallas_call(
            kernel,
            out_shape=jax.ShapeDtypeStruct((rows, HW_pad), x.dtype),
            grid=(nb,),
            in_specs=[pl.BlockSpec((rb, HW_pad), lambda i: (i, 0))] +
                     [pl.BlockSpec(p.shape, lambda i: (0, 0)) for p in params],
            out_specs=pl.BlockSpec((rb, HW_pad), lambda i: (i, 0)),
            compiler_params=pltpu.CompilerParams(
                dimension_semantics=("parallel",),
                vmem_limit_bytes=vmem_limit),
        )(x2, *params)
    else:
        # ---- fallback: spatial-split reduction + second rescale pass ----
        nb_rows = max(_valid_row_splits(B, C))      # smallest whole-batch block
        rb = rows // nb_rows
        spb = _pick_spatial_split(rb, HW_pad, itemsize, target)
        n_sp = HW_pad // spb
        params = _build_mlp_params(w1, b1, w2, b2, C, R, rb // C)
        params_bytes = sum(int(p.size) * 4 for p in params)
        block_bytes = rb * spb * itemsize
        vmem_limit = _vmem_limit(block_bytes, params_bytes, vmem_cap, bufs)

        reduce_kernel = functools.partial(
            _ca_reduce_kernel, hw_valid=HW, inv_hw=1.0 / HW, spb=spb,
            needs_mask=needs_mask)
        scale = pl.pallas_call(
            reduce_kernel,
            out_shape=jax.ShapeDtypeStruct((rows, 1), jnp.float32),
            grid=(nb_rows, n_sp),
            in_specs=[pl.BlockSpec((rb, spb), lambda i, j: (i, j))] +
                     [pl.BlockSpec(p.shape, lambda i, j: (0, 0)) for p in params],
            out_specs=pl.BlockSpec((rb, 1), lambda i, j: (i, 0)),
            scratch_shapes=[pltpu.VMEM((rb, 1), jnp.float32),
                            pltpu.VMEM((rb, 1), jnp.float32)],
            compiler_params=pltpu.CompilerParams(
                dimension_semantics=("parallel", "arbitrary"),
                vmem_limit_bytes=vmem_limit),
        )(x2, *params)

        # TODO(synk): when B == 1 the row axis has a single block; split rows
        # further for this pass (scale rows need not be whole batches here) so
        # both v7x TensorCores share the rescale work.
        out = pl.pallas_call(
            _ca_rescale_kernel,
            out_shape=jax.ShapeDtypeStruct((rows, HW_pad), x.dtype),
            grid=(nb_rows, n_sp),
            in_specs=[pl.BlockSpec((rb, spb), lambda i, j: (i, j)),
                      pl.BlockSpec((rb, 1), lambda i, j: (i, 0))],
            out_specs=pl.BlockSpec((rb, spb), lambda i, j: (i, j)),
            compiler_params=pltpu.CompilerParams(
                dimension_semantics=("parallel", "parallel"),
                vmem_limit_bytes=vmem_limit),
        )(x2, scale)

    if needs_mask:
        out = out[:, :HW]
    return out.reshape(B, C, H, W)


# --------------------------------------------------------------------------
# Pure-JAX reference
# --------------------------------------------------------------------------
def _reference(x, w1, b1, w2, b2):
    a = jnp.mean(x, axis=(2, 3))
    m = jnp.max(x, axis=(2, 3))

    def fc(v):
        h = v @ w1 + b1.reshape(1, -1)
        h = jnp.where(h >= 0.0, h, 0.1 * h)
        return h @ w2 + b2.reshape(1, -1)

    scale = jax.nn.sigmoid(fc(a) + fc(m)) * 2.0
    return x * scale[:, :, None, None]


if __name__ == "__main__":
    # Module config: ChannelAttention(num_feat=4, reduction=16)
    #   -> r_feat = max(8, 4 // 16) = 8
    num_feat = 4
    reduction = 16
    r_feat = max(8, num_feat // reduction)

    key = jax.random.PRNGKey(0)
    kx, k1, k2, k3, k4, kx2 = jax.random.split(key, 6)

    # Parameters stored transposed for row-vector matmul:
    #   fc[0]: Linear(num_feat, r_feat) -> w1 (num_feat, r_feat), b1 (1, r_feat)
    #   fc[2]: Linear(r_feat, num_feat) -> w2 (r_feat, num_feat), b2 (1, num_feat)
    w1 = jax.random.normal(k1, (num_feat, r_feat), jnp.float32) * 0.1
    b1 = jax.random.normal(k2, (1, r_feat), jnp.float32) * 0.01
    w2 = jax.random.normal(k3, (r_feat, num_feat), jnp.float32) * 0.1
    b2 = jax.random.normal(k4, (1, num_feat), jnp.float32) * 0.01

    # 1) main config: fused single-pass path, 128-aligned spatial extent.
    x = jax.random.normal(kx, (2, num_feat, 16, 16), jnp.float32)
    out = jax.block_until_ready(channel_attention(x, w1, b1, w2, b2))
    ref = _reference(x, w1, b1, w2, b2)
    assert jnp.allclose(out, ref, atol=1e-5, rtol=1e-5), "fused path mismatch"

    # 2) unaligned spatial extent -> lane padding + masked max.
    x12 = jax.random.normal(kx2, (2, num_feat, 12, 12), jnp.float32)
    out12 = jax.block_until_ready(channel_attention(x12, w1, b1, w2, b2))
    ref12 = _reference(x12, w1, b1, w2, b2)
    assert jnp.allclose(out12, ref12, atol=1e-5, rtol=1e-5), "padded path mismatch"

    # 3) force the spatial-split fallback (scratch accumulators + second
    #    rescale pass) that large feature maps take on v7x's 64 MiB VMEM.
    out_sp = jax.block_until_ready(
        channel_attention(x, w1, b1, w2, b2,
                          target_block_bytes=4096, max_block_bytes=4096))
    assert jnp.allclose(out_sp, ref, atol=1e-5, rtol=1e-5), "spatial-split mismatch"

    print("KERNEL_OK")
</pallas_src>

<mosaic_0001>
module attributes {stable_mosaic.version = 11 : i64} {
  func.func @_ca_fused_kernel(%arg0: i32, %arg1: memref<8x256xf32, #tpu.memory_space<vmem>>, %arg2: memref<8x8xf32, #tpu.memory_space<vmem>>, %arg3: memref<8x8xf32, #tpu.memory_space<vmem>>, %arg4: memref<1x8xf32, #tpu.memory_space<vmem>>, %arg5: memref<8x1xf32, #tpu.memory_space<vmem>>, %arg6: memref<2x8xf32, #tpu.memory_space<vmem>>, %arg7: memref<8x2xf32, #tpu.memory_space<vmem>>, %arg8: memref<8x256xf32, #tpu.memory_space<vmem>>) attributes {dimension_semantics = [#tpu.dimension_semantics<parallel>], iteration_bounds = array<i64: 1>, scalar_prefetch = 0 : i64, scratch_operands = 0 : i64, tpu.core_type = #tpu.core_type<tc>, window_params = [{transform_indices = @transform_0, window_bounds = array<i64: 8, 256>}, {pipeline_mode = #tpu.pipeline_mode<synchronous>, transform_indices = @transform_1, window_bounds = array<i64: 8, 8>}, {pipeline_mode = #tpu.pipeline_mode<synchronous>, transform_indices = @transform_2, window_bounds = array<i64: 8, 8>}, {pipeline_mode = #tpu.pipeline_mode<synchronous>, transform_indices = @transform_3, window_bounds = array<i64: 1, 8>}, {pipeline_mode = #tpu.pipeline_mode<synchronous>, transform_indices = @transform_4, window_bounds = array<i64: 8, 1>}, {pipeline_mode = #tpu.pipeline_mode<synchronous>, transform_indices = @transform_5, window_bounds = array<i64: 2, 8>}, {pipeline_mode = #tpu.pipeline_mode<synchronous>, transform_indices = @transform_6, window_bounds = array<i64: 8, 2>}, {transform_indices = @transform_7, window_bounds = array<i64: 8, 256>}]} {
    %c0 = arith.constant 0 : index
    %c0_0 = arith.constant 0 : index
    %0 = vector.load %arg1[%c0, %c0_0] : memref<8x256xf32, #tpu.memory_space<vmem>>, vector<8x256xf32>
    %cst = arith.constant dense<0.000000e+00> : vector<8xf32>
    %1 = vector.multi_reduction <add>, %0, %cst [1] : vector<8x256xf32> to vector<8xf32>
    %2 = vector.shape_cast %1 : vector<8xf32> to vector<8x1xf32>
    %cst_1 = arith.constant 3.906250e-03 : f32
    %3 = vector.broadcast %cst_1 : f32 to vector<8x1xf32>
    %4 = arith.mulf %2, %3 : vector<8x1xf32>
    %cst_2 = arith.constant dense<0xFF800000> : vector<8xf32>
    %5 = vector.multi_reduction <maximumf>, %0, %cst_2 [1] : vector<8x256xf32> to vector<8xf32>
    %6 = vector.shape_cast %5 : vector<8xf32> to vector<8x1xf32>
    %c0_3 = arith.constant 0 : index
    %c0_4 = arith.constant 0 : index
    %7 = vector.load %arg2[%c0_3, %c0_4] : memref<8x8xf32, #tpu.memory_space<vmem>>, vector<8x8xf32>
    %c0_5 = arith.constant 0 : index
    %c0_6 = arith.constant 0 : index
    %8 = vector.load %arg3[%c0_5, %c0_6] : memref<8x8xf32, #tpu.memory_space<vmem>>, vector<8x8xf32>
    %c0_7 = arith.constant 0 : index
    %c0_8 = arith.constant 0 : index
    %9 = vector.load %arg4[%c0_7, %c0_8] : memref<1x8xf32, #tpu.memory_space<vmem>>, vector<1x8xf32>
    %c0_9 = arith.constant 0 : index
    %c0_10 = arith.constant 0 : index
    %10 = vector.load %arg5[%c0_9, %c0_10] : memref<8x1xf32, #tpu.memory_space<vmem>>, vector<8x1xf32>
    %c0_11 = arith.constant 0 : index
    %c0_12 = arith.constant 0 : index
    %11 = vector.load %arg6[%c0_11, %c0_12] : memref<2x8xf32, #tpu.memory_space<vmem>>, vector<2x8xf32>
    %c0_13 = arith.constant 0 : index
    %c0_14 = arith.constant 0 : index
    %12 = vector.load %arg7[%c0_13, %c0_14] : memref<8x2xf32, #tpu.memory_space<vmem>>, vector<8x2xf32>
    %13 = vector.broadcast %4 : vector<8x1xf32> to vector<8x8xf32>
    %14 = arith.mulf %13, %7 : vector<8x8xf32>
    %15 = vector.broadcast %6 : vector<8x1xf32> to vector<8x8xf32>
    %16 = arith.mulf %15, %7 : vector<8x8xf32>
    %cst_15 = arith.constant dense<0.000000e+00> : vector<2x8xf32>
    %17 = tpu.matmul %11, %14, %cst_15 {dimension_numbers = #tpu.dot_dimension_numbers<[1], [0], [0], [1], [0, 0, 1, 1], [], []>} : vector<2x8xf32>, vector<8x8xf32>, vector<2x8xf32> -> vector<2x8xf32>
    %18 = vector.broadcast %9 : vector<1x8xf32> to vector<2x8xf32>
    %19 = arith.addf %17, %18 : vector<2x8xf32>
    %cst_16 = arith.constant 0.000000e+00 : f32
    %20 = vector.broadcast %cst_16 : f32 to vector<2x8xf32>
    %21 = arith.cmpf oge, %19, %20 : vector<2x8xf32>
    %cst_17 = arith.constant 1.000000e-01 : f32
    %22 = vector.broadcast %cst_17 : f32 to vector<2x8xf32>
    %23 = arith.mulf %22, %19 : vector<2x8xf32>
    %24 = arith.select %21, %19, %23 : vector<2x8xi1>, vector<2x8xf32>
    %cst_18 = arith.constant dense<0.000000e+00> : vector<2x8xf32>
    %25 = tpu.matmul %11, %16, %cst_18 {dimension_numbers = #tpu.dot_dimension_numbers<[1], [0], [0], [1], [0, 0, 1, 1], [], []>} : vector<2x8xf32>, vector<8x8xf32>, vector<2x8xf32> -> vector<2x8xf32>
    %26 = vector.broadcast %9 : vector<1x8xf32> to vector<2x8xf32>
    %27 = arith.addf %25, %26 : vector<2x8xf32>
    %cst_19 = arith.constant 0.000000e+00 : f32
    %28 = vector.broadcast %cst_19 : f32 to vector<2x8xf32>
    %29 = arith.cmpf oge, %27, %28 : vector<2x8xf32>
    %cst_20 = arith.constant 1.000000e-01 : f32
    %30 = vector.broadcast %cst_20 : f32 to vector<2x8xf32>
    %31 = arith.mulf %30, %27 : vector<2x8xf32>
    %32 = arith.select %29, %27, %31 : vector<2x8xi1>, vector<2x8xf32>
    %33 = arith.addf %24, %32 : vector<2x8xf32>
    %cst_21 = arith.constant dense<0.000000e+00> : vector<8x8xf32>
    %34 = tpu.matmul %12, %33, %cst_21 {dimension_numbers = #tpu.dot_dimension_numbers<[1], [0], [0], [1], [0, 0, 1, 1], [], []>} : vector<8x2xf32>, vector<2x8xf32>, vector<8x8xf32> -> vector<8x8xf32>
    %35 = arith.mulf %34, %8 : vector<8x8xf32>
    %cst_22 = arith.constant dense<0.000000e+00> : vector<8xf32>
    %36 = vector.multi_reduction <add>, %35, %cst_22 [1] : vector<8x8xf32> to vector<8xf32>
    %37 = vector.shape_cast %36 : vector<8xf32> to vector<8x1xf32>
    %cst_23 = arith.constant 2.000000e+00 : f32
    %38 = vector.broadcast %cst_23 : f32 to vector<8x1xf32>
    %39 = arith.mulf %38, %10 : vector<8x1xf32>
    %40 = arith.addf %37, %39 : vector<8x1xf32>
    %41 = arith.negf %40 : vector<8x1xf32>
    %42 = math.exp %41 : vector<8x1xf32>
    %cst_24 = arith.constant 1.000000e+00 : f32
    %43 = vector.broadcast %cst_24 : f32 to vector<8x1xf32>
    %44 = arith.addf %43, %42 : vector<8x1xf32>
    %45 = arith.divf %43, %44 : vector<8x1xf32>
    %cst_25 = arith.constant 2.000000e+00 : f32
    %46 = vector.broadcast %cst_25 : f32 to vector<8x1xf32>
    %47 = arith.mulf %45, %46 : vector<8x1xf32>
    %48 = vector.broadcast %47 : vector<8x1xf32> to vector<8x256xf32>
    %49 = arith.mulf %0, %48 : vector<8x256xf32>
    %c0_26 = arith.constant 0 : index
    %c0_27 = arith.constant 0 : index
    %50 = vector.load %arg8[%c0_26, %c0_27] : memref<8x256xf32, #tpu.memory_space<vmem>>, vector<8x256xf32>
    tpu.vector_store %arg8[%c0_26, %c0_27], %49 {strides = array<i32>} : memref<8x256xf32, #tpu.memory_space<vmem>>, vector<8x256xf32>,
    return
  }
  func.func @transform_0(%arg0: i32) -> (i32, i32) {
    %c0_i32 = arith.constant 0 : i32
    %c0_i32_0 = arith.constant 0 : i32
    return %arg0, %c0_i32 : i32, i32
  }
  func.func @transform_1(%arg0: i32) -> (i32, i32) {
    %c0_i32 = arith.constant 0 : i32
    %c0_i32_0 = arith.constant 0 : i32
    %c0_i32_1 = arith.constant 0 : i32
    return %c0_i32, %c0_i32_0 : i32, i32
  }
  func.func @transform_2(%arg0: i32) -> (i32, i32) {
    %c0_i32 = arith.constant 0 : i32
    %c0_i32_0 = arith.constant 0 : i32
    %c0_i32_1 = arith.constant 0 : i32
    return %c0_i32, %c0_i32_0 : i32, i32
  }
  func.func @transform_3(%arg0: i32) -> (i32, i32) {
    %c0_i32 = arith.constant 0 : i32
    %c0_i32_0 = arith.constant 0 : i32
    %c0_i32_1 = arith.constant 0 : i32
    return %c0_i32, %c0_i32_0 : i32, i32
  }
  func.func @transform_4(%arg0: i32) -> (i32, i32) {
    %c0_i32 = arith.constant 0 : i32
    %c0_i32_0 = arith.constant 0 : i32
    %c0_i32_1 = arith.constant 0 : i32
    return %c0_i32, %c0_i32_0 : i32, i32
  }
  func.func @transform_5(%arg0: i32) -> (i32, i32) {
    %c0_i32 = arith.constant 0 : i32
    %c0_i32_0 = arith.constant 0 : i32
    %c0_i32_1 = arith.constant 0 : i32
    return %c0_i32, %c0_i32_0 : i32, i32
  }
  func.func @transform_6(%arg0: i32) -> (i32, i32) {
    %c0_i32 = arith.constant 0 : i32
    %c0_i32_0 = arith.constant 0 : i32
    %c0_i32_1 = arith.constant 0 : i32
    return %c0_i32, %c0_i32_0 : i32, i32
  }
  func.func @transform_7(%arg0: i32) -> (i32, i32) {
    %c0_i32 = arith.constant 0 : i32
    %c0_i32_0 = arith.constant 0 : i32
    return %arg0, %c0_i32 : i32, i32
  }
}

</mosaic_0001>

<bundles_post_ra>
// kernel: tpu_custom_call.1
= control target key start
LH: loop header
LB: loop body
LE: loop exit
PB: predicated region body
PF: predicated region fallthrough
CT: control target
= control target key end

     0   :  { %12 = vsyncpa [#allocation3], 0  ;;  %s532_s0 = inlined_call_operand.vmem [shape: f32[8,256], index: 0, kind: input, shape index: {}]   ;;  %s533_s1 = inlined_call_operand.hbm [shape: f32[8,8], index: 1, kind: input, shape index: {}]   ;;  %s534_s2 = inlined_call_operand.hbm [shape: f32[8,8], index: 2, kind: input, shape index: {}]   ;;  %s535_s3 = inlined_call_operand.vmem [shape: f32[1,8], index: 3, kind: input, shape index: {}]   ;;  %s536_s4 = inlined_call_operand.vmem [shape: f32[8,1], index: 4, kind: input, shape index: {}]   ;;  %s537_s5 = inlined_call_operand.vmem [shape: f32[2,8], index: 5, kind: input, shape index: {}]   ;;  %s538_s6 = inlined_call_operand.vmem [shape: f32[8,2], index: 6, kind: input, shape index: {}]   ;;  %s539_s7 = inlined_call_operand.hbm [shape: f32[8,256], index: 7, kind: output, shape index: {}]  }
   0x1   :  { %13 = vsyncpa [#allocation6], 0 }
   0x2   :  { %14 = vsyncpa [#allocation4], 0  ;;  %s446_s24 = smov [#allocation2]   ;;  %s447_s26 = smov [#allocation5]  }
   0x3   :  { %s23_s25 = sshll.u32 %s446_s24, 4  ;;  %s33_s27 = sshll.u32 %s447_s26, 4  ;;  %s24_s25 = int_to_ptr.vmem [resolvable:$true] %s23_s25  ;;  %s34_s27 = int_to_ptr.vmem [resolvable:$true] %s33_s27 }
   0x4   :  { %s388_s28 = scalar_lea.vmem %s24_s25, 128  ;;  %p393_p1 = scmp.lt.s32.totalorder %s24_s25, %s24_s25 }
   0x5   :  { %p389_p0 = scmp.ne.s32.totalorder %s24_s25, %s388_s28  ;;  %p394_p2 = scmp.lt.s32.totalorder %s388_s28, %s388_s28 }
   0x7   :  { %p395_p3 = por %p394_p2, %p393_p1 }
   0x9   :  { %p396_p4 = pnand %p395_p3, %p389_p0 }
   0xb   :  { %399 = shalt.err (!%p396_p4)
}
   0xc   :  { %26 = dma.hbm_to_vmem [thread:$0]  %s533_s1, 128, %s24_s25, [#allocation3]  }
   0xd   :  { %s408_s8 = scalar_lea.vmem %s34_s27, 128  ;;  %p413_p6 = scmp.lt.s32.totalorder %s34_s27, %s34_s27 }
   0xe   :  { %p409_p5 = scmp.ne.s32.totalorder %s34_s27, %s408_s8  ;;  %p414_p7 = scmp.lt.s32.totalorder %s408_s8, %s408_s8 }
  0x10   :  { %p415_p8 = por %p414_p7, %p413_p6 }
  0x12   :  { %p416_p9 = pnand %p415_p8, %p409_p5 }
  0x14   :  { %419 = shalt.err (!%p416_p9)
}
  0x15   :  { %36 = dma.hbm_to_vmem [thread:$0]  %s534_s2, 128, %s34_s27, [#allocation6]  }
  0x16   :  { %440 = dma.done.wait [#allocation3], 128  }
  0x17   :  { %441 = vsyncadd [#allocation3], 4294967168 }
  0x18   :  { %442 = dma.done.wait [#allocation6], 128  }
  0x19   :  { %443 = vsyncadd [#allocation6], 4294967168  ;;  %v501_v0 = vld [vmem:[%s532_s0] sm:$0xff]  ;;  %v506_v1 = vld [vmem:[%s532_s0 + $0x8] sm:$0xff]  ;;  %v448_v4 = vmov 0.0   ;;  %vm449_vm0 = vmmov 0  }
  0x1a   :  { %v53_v2 = vadd.f32 %v506_v1, %v501_v0  ;;  %v57_v3 = vmax.f32 %v501_v0, %v506_v1  ;;  %353 = vmatprep.subr.mxu0 %v448_v4  ;;  %358 = vmatprep.subr.mxu1 %v448_v4  ;;  %v60_v6 = vld [vmem:[#allocation2] sm:$0xff]  ;;  %vm74_vm1 = vcmask 64512   ;;  %vm229_vm4 = vcmask 1041408   ;;  %v61_v25 = vld [vmem:[#allocation5] sm:$0xff] }
  0x1b   :  { %355 = vmatprep.mubr.msk.f32.mxu0 %vm449_vm0, %v448_v4  ;;  %360 = vmatprep.mubr.msk.f32.mxu1 %vm449_vm0, %v448_v4  ;;  %v64_v9 = vld [vmem:[%s537_s5] sm:$0x3]  ;;  %vm225_vm5 = vcmask 15360   ;;  %v450_v30 = vmov 0  }
  0x1c   :  { %54 = vadd.xlane.f32.xlu0 %v53_v2  ;;  %v341_v12 = vld [vmem:[%s535_s3] ss:$0 sm:$0xff]  ;;  %374 = vset.pattern.permute.xlu1 %v450_v30 }
  0x1d   :  { %v65_v24 = vld [vmem:[%s538_s6] sm:$0xff]  ;;  %375 = vset.pattern.permute.xlu0 %v450_v30  ;;  %s451_s6 = smov [#allocation7]  }
  0x1e   :  { %v63_v31 = vld [vmem:[%s536_s4] sm:$0xff]  ;;  %s331_s18 = sshll.u32 %s451_s6, 4  ;;  %s332_s18 = int_to_ptr.vmem [resolvable:$true] %s331_s18 }
  0x1f   :  { %v307_v32 = vmul.f32 2.0, %v63_v31  ;;  %s420_s4 = scalar_lea.vmem %s332_s18, 256  ;;  %p425_p11 = scmp.lt.s32.totalorder %s332_s18, %s332_s18 }
  0x20   :  { %58 = vmax.xlane.f32.xlu0 %v57_v3  ;;  %p421_p10 = scmp.ne.s32.totalorder %s332_s18, %s420_s4  ;;  %p426_p12 = scmp.lt.s32.totalorder %s420_s4, %s420_s4 }
  0x22   :  { %p427_p13 = por %p426_p12, %p425_p11 }
  0x24   :  { %p428_p0 = pnand %p427_p13, %p421_p10 }
  0xa5   :  { %v55_v5 = vpop.xlane.xlu0 %54 }
  0xa6   :  { %v56_v7 = vmul.f32 0.00390625, %v55_v5 }
  0xa8   :  { %v66_v8 = vmul.f32 %v60_v6, %v56_v7 }
  0xa9   :  { %v59_v10 = vpop.xlane.xlu0 %58 }
  0xaa   :  { %v67_v11 = vmul.f32 %v60_v6, %v59_v10  ;;  %354 = vmatpush3.msra.mxu0 %v66_v8 }
  0xab   :  { %356 = vmatmul.mubr.msk.f32.vlgmr.msra.gmra.mxu0 %vm74_vm1, %v64_v9  ;;  %363 = vmatprep.subr.mxu0 %v448_v4 }
  0xac   :  { %359 = vmatpush3.msra.mxu1 %v67_v11  ;;  %365 = vmatprep.mubr.msk.f32.mxu0 %vm449_vm0, %v448_v4 }
  0xad   :  { %361 = vmatmul.mubr.msk.f32.vlgmr.msra.gmra.mxu1 %vm74_vm1, %v64_v9 }
 0x16b   :  { %v144_v13 = vpop.f32.mrf.mxu0 }
 0x16c   :  { %v145_v14 = vadd.f32 %v341_v12, %v144_v13 }
 0x16d   :  { %v357_v15 = vpop.f32.mrf.mxu0  ;;  %v217_v16 = vpop.f32.mrf.mxu1 }
 0x16e   :  { %v149_v17 = vmul.f32 0.1, %v145_v14  ;;  %v218_v18 = vadd.f32 %v341_v12, %v217_v16  ;;  %vm148_vm2 = vcmp.ge.f32.partialorder %v145_v14, 0.0 }
 0x16f   :  { %v362_v19 = vpop.f32.mrf.mxu1 }
 0x170   :  { %vm221_vm3 = vcmp.ge.f32.partialorder %v218_v18, 0.0  ;;  %v222_v20 = vmul.f32 0.1, %v218_v18  ;;  %v150_v21 = vsel %vm148_vm2, %v145_v14, %v149_v17 }
 0x172   :  { %v223_v22 = vsel %vm221_vm3, %v218_v18, %v222_v20 }
 0x173   :  { %v224_v23 = vadd.f32 %v223_v22, %v150_v21 }
 0x175   :  { %364 = vmatpush3.msk.msra.mxu0 %vm229_vm4, %v224_v23 }
 0x176   :  { %366 = vmatmul.mubr.msk.f32.vlgmr.msra.gmra.mxu0 %vm225_vm5, %v65_v24 }
 0x236   :  { %v299_v26 = vpop.f32.mrf.mxu0 }
 0x237   :  { %v303_v27 = vmul.f32 %v299_v26, %v61_v25 }
 0x238   :  { %v367_v28 = vpop.f32.mrf.mxu0 }
 0x239   :  { %v304_v29 = vsel %vm74_vm1, %v303_v27, 0.0 }
 0x23a   :  { %305 = vadd.xlane.f32.xlu1 %v304_v29 }
 0x2c3   :  { %v306_v33 = vpop.xlane.xlu1 %305 }
 0x2c4   :  { %v308_v34 = vadd.f32 %v307_v32, %v306_v33 }
 0x2c6   :  { %v346_v35 = vmul.f32 -1.442695, %v308_v34 }
 0x2c8   :  { %376 = vpow2.f32 %v346_v35 }
 0x2d5   :  { %v377_v36 = vpop.eup %376 }
 0x2d6   :  { %v312_v37 = vadd.f32 1.0, %v377_v36 }
 0x2d8   :  { %378 = vrcp.f32 %v312_v37 }
 0x2e5   :  { %v379_v38 = vpop.eup %378 }
 0x2e6   :  { %v315_v39 = vmul.f32 2.0, %v379_v38 }
 0x2e8   :  { %318 = vperm.xlu1 %374, %v315_v39  }
 0x363   :  { %v319_v40 = vpop.permute.xlu1 %318 }
 0x364   :  { %v321_v41 = vmul.f32 %v319_v40, %v501_v0  ;;  %v322_v42 = vmul.f32 %v319_v40, %v506_v1 }
 0x366   :  { %323 = vst [vmem:[#allocation7] sm:$0xff] %v321_v41  ;;  %324 = vst [vmem:[#allocation7 + $0x8] sm:$0xff] %v322_v42 }
 0x367   :  { %431 = shalt.err (!%p428_p0)
}
 0x368   :  { %334 = dma.vmem_to_hbm [thread:$0]  %s332_s18, 256, %s539_s7, [#allocation4]  }
 0x369   :  { %444 = dma.done.wait [#allocation4], 256  }
 0x36a   :  { %445 = vsyncadd [#allocation4], 4294967040 }
 0x36b   :  { %338 = vsyncpa [#allocation3], 1 }
 0x36c   :  { %339 = vsyncpa [#allocation6], 1 }
 0x36d   :  { %340 = vsyncpa [#allocation4], 1 }

</bundles_post_ra>
